<compile_context>
chip_gen: v7x
topology: tpu7x:2x2x1
jax: 0.10.0
libtpu: 0.0.40
codegen_flags: <defaults>
</compile_context>

<pallas_src>
import functools

import jax
import jax.numpy as jnp
import numpy as np
from jax.experimental import pallas as pl
from jax.experimental.pallas import tpu as pltpu


# ------------------------------- small utils --------------------------------

def _pair(v):
    return (v, v) if isinstance(v, int) else tuple(v)


def _round_up(v, m):
    return ((v + m - 1) // m) * m


def _choose_row_tile(M):
    """Pick the lane (pixel) tile for the matmul grid.

    Large tiles (up to 512) amortize the ~0.35us per-grid-step overhead; when M
    allows, keep >= 2 grid steps so both v7x TensorCores get work.
    """
    Mp128 = _round_up(M, 128)
    if Mp128 <= 128:
        return 128, 128
    tm = min(512, max(128, (Mp128 // 2 // 128) * 128))
    return tm, _round_up(M, tm)


def _lane_tile(Mp):
    """Tile for the elementwise affine pass over an (C, Mp) array."""
    if Mp >= 1024 and Mp % 512 == 0:
        return 512
    if Mp >= 256 and Mp % 128 == 0:
        return 128
    return Mp  # Mp is always a multiple of 128 by construction


# ----------------------------- Pallas kernels ------------------------------

def _apply_act(y, act):
    if act == "leaky":
        return jnp.where(y > 0, y, 0.2 * y)
    if act == "relu":
        return jnp.maximum(y, 0.0)
    if act == "sigmoid":
        return 1.0 / (1.0 + jnp.exp(-y))
    return y


def _matmul_act_kernel(w_ref, x_ref, o_ref, *, act):
    # (Np, Kp) bf16 @ (Kp, tm) bf16 -> (Np, tm) f32, activation fused.
    y = jnp.dot(w_ref[...], x_ref[...], preferred_element_type=jnp.float32)
    o_ref[...] = _apply_act(y, act).astype(o_ref.dtype)


def pallas_matmul_act(wmat, cols, tm, act):
    """(Np, Kp) @ (Kp, Mp) -> (Np, Mp), lane-dense output, tiled over lanes."""
    Np, Kp = wmat.shape
    _, Mp = cols.shape
    return pl.pallas_call(
        functools.partial(_matmul_act_kernel, act=act),
        out_shape=jax.ShapeDtypeStruct((Np, Mp), jnp.float32),
        grid=(Mp // tm,),
        in_specs=[
            pl.BlockSpec((Np, Kp), lambda i: (0, 0)),   # weights: resident
            pl.BlockSpec((Kp, tm), lambda i: (0, i)),   # im2col^T pixel tile
        ],
        out_specs=pl.BlockSpec((Np, tm), lambda i: (0, i)),
        compiler_params=pltpu.CompilerParams(
            dimension_semantics=("parallel",)),
    )(wmat, cols)


def _affine_act_kernel(x_ref, s_ref, b_ref, o_ref, *, act):
    # x: (C, t), s/b: (C, 1) broadcast along lanes.
    y = x_ref[...] * s_ref[...] + b_ref[...]
    o_ref[...] = _apply_act(y, act).astype(o_ref.dtype)


def pallas_affine_act(y, scale, shift, act):
    """y: (C, Mp); scale/shift: (C, 1).  Channels on sublanes, pixels on lanes."""
    C, Mp = y.shape
    t = _lane_tile(Mp)
    return pl.pallas_call(
        functools.partial(_affine_act_kernel, act=act),
        out_shape=jax.ShapeDtypeStruct((C, Mp), jnp.float32),
        grid=(Mp // t,),
        in_specs=[
            pl.BlockSpec((C, t), lambda i: (0, i)),
            pl.BlockSpec((C, 1), lambda i: (0, 0)),
            pl.BlockSpec((C, 1), lambda i: (0, 0)),
        ],
        out_specs=pl.BlockSpec((C, t), lambda i: (0, i)),
        compiler_params=pltpu.CompilerParams(
            dimension_semantics=("parallel",)),
    )(y, scale, shift)


# ------------------------------ conv lowering -------------------------------

def _im2colT(x, kh, kw, sh, sw, ph, pw):
    """x: (C, B, H, W) -> cols^T (Kp, Mp) bf16, plus (Ho, Wo, tm).

    Row index = c*(kh*kw) + i*kw + j (matches PyTorch weight flattening);
    column index = b*(Ho*Wo) + ho*Wo + wo.  Built with strided slices + one
    stack + a contiguous reshape -- no 5-D transpose.  K/M zero-padding is
    folded into the same copy (padded lanes/rows multiply to exact zeros).
    """
    C, B, H, W = x.shape
    Ho = (H + 2 * ph - kh) // sh + 1
    Wo = (W + 2 * pw - kw) // sw + 1
    M = B * Ho * Wo
    tm, Mp = _choose_row_tile(M)

    xp = jnp.pad(x.astype(jnp.bfloat16), ((0, 0), (0, 0), (ph, ph), (pw, pw)))
    pieces = []
    for i in range(kh):
        for j in range(kw):
            pieces.append(xp[:, :, i:i + sh * Ho:sh, j:j + sw * Wo:sw])
    cols = jnp.stack(pieces, axis=1)                 # (C, kh*kw, B, Ho, Wo)
    cols = cols.reshape(C * kh * kw, M)              # contiguous reshape

    K = C * kh * kw
    Kp = _round_up(K, 16)                            # bf16 sublane friendliness
    cols = jnp.pad(cols, ((0, Kp - K), (0, Mp - M)))
    return cols, Ho, Wo, tm


def conv2d_flat(x, w, stride, padding, act="none"):
    """x: (Cin, B, H, W);  w: (Cout, Cin, kh, kw)  ->  (y (Np, Mp) f32, Ho, Wo).

    Lanes >= B*Ho*Wo (and rows >= Cout) of y are padding; slice before use.
    """
    Cout, Cin, kh, kw = w.shape
    sh, sw = _pair(stride)
    ph, pw = _pair(padding)
    cols, Ho, Wo, tm = _im2colT(x, kh, kw, sh, sw, ph, pw)

    K = Cin * kh * kw
    Kp = cols.shape[0]
    Np = _round_up(Cout, 8)
    wmat = w.reshape(Cout, K).astype(jnp.bfloat16)
    if Kp != K or Np != Cout:
        wmat = jnp.pad(wmat, ((0, Np - Cout), (0, Kp - K)))

    y = pallas_matmul_act(wmat, cols, tm, act)       # (Np, Mp) f32
    return y, Ho, Wo


def conv_transpose2d_flat(x, w, stride, padding, act="none"):
    """x: (Cin, B, H, W); w: (Cin, Cout, kh, kw) (PyTorch ConvTranspose2d)."""
    Cin, Cout, kh, kw = w.shape
    sh, sw = _pair(stride)
    ph, pw = _pair(padding)
    C, B, H, W = x.shape
    Hd, Wd = (H - 1) * sh + 1, (W - 1) * sw + 1
    xd = jnp.zeros((C, B, Hd, Wd), x.dtype).at[:, :, ::sh, ::sw].set(x)
    wf = w[:, :, ::-1, ::-1].transpose(1, 0, 2, 3)   # (Cout, Cin, kh, kw), flipped
    return conv2d_flat(xd, wf, (1, 1), (kh - 1 - ph, kw - 1 - pw), act)


def flat_to_cnhw(y, C, B, Ho, Wo):
    """Drop padded rows/lanes and restore spatial structure (C, B, Ho, Wo)."""
    return y[:C, :B * Ho * Wo].reshape(C, B, Ho, Wo)


def batchnorm_act_flat(y, M, gamma, beta, act, eps=1e-5):
    """Training-mode BatchNorm2d + activation on the flat (C, Mp) conv output.

    y must be the *pre-activation* conv output: its padded lanes are exact
    zeros, so sums over all Mp lanes divided by the true M give the batch
    statistics.  (Folding scale/shift into the next conv would not be exact
    because of the intervening nonlinearity.)
    """
    C, _ = y.shape
    assert gamma.shape[0] == C and beta.shape[0] == C
    mean = jnp.sum(y, axis=1) / M
    var = jnp.sum(y * y, axis=1) / M - mean * mean   # biased variance
    scale = gamma / jnp.sqrt(var + eps)
    shift = beta - mean * scale
    return pallas_affine_act(y, scale.reshape(C, 1), shift.reshape(C, 1), act)


# --------------------- NCHW convenience wrappers (checks) -------------------

def conv2d(x, w, stride, padding, act="none"):
    B = x.shape[0]
    y, Ho, Wo = conv2d_flat(jnp.transpose(x, (1, 0, 2, 3)), w, stride, padding, act)
    return jnp.transpose(flat_to_cnhw(y, w.shape[0], B, Ho, Wo), (1, 0, 2, 3))


def conv_transpose2d(x, w, stride, padding, act="none"):
    B = x.shape[0]
    y, Ho, Wo = conv_transpose2d_flat(
        jnp.transpose(x, (1, 0, 2, 3)), w, stride, padding, act)
    return jnp.transpose(flat_to_cnhw(y, w.shape[1], B, Ho, Wo), (1, 0, 2, 3))


# ------------------------------- AutoEncoder --------------------------------

def autoencoder_forward(x, p):
    B = x.shape[0]
    xc = jnp.transpose(x, (1, 0, 2, 3))                      # (C, B, H, W)

    # ---- Encoder ----
    y, Ho, Wo = conv2d_flat(xc, p["e1_w"], (2, 2), (1, 1), act="leaky")
    h = flat_to_cnhw(y, p["e1_w"].shape[0], B, Ho, Wo)

    y, Ho, Wo = conv2d_flat(h, p["e2_w"], (2, 2), (1, 1), act="none")
    y = batchnorm_act_flat(y, B * Ho * Wo, p["e2_g"], p["e2_b"], act="leaky")
    h = flat_to_cnhw(y, p["e2_w"].shape[0], B, Ho, Wo)

    y, Ho, Wo = conv2d_flat(h, p["e3_w"], (2, 2), (1, 1), act="none")
    y = batchnorm_act_flat(y, B * Ho * Wo, p["e3_g"], p["e3_b"], act="leaky")
    h = flat_to_cnhw(y, p["e3_w"].shape[0], B, Ho, Wo)

    y, Ho, Wo = conv2d_flat(h, p["e4_w"], (1, 1), (0, 0), act="none")
    enc_c = flat_to_cnhw(y, p["e4_w"].shape[0], B, Ho, Wo)   # (nz, B, 1, 1)

    # ---- Decoder ----
    y, Ho, Wo = conv_transpose2d_flat(enc_c, p["d1_w"], (1, 1), (0, 0), act="none")
    y = batchnorm_act_flat(y, B * Ho * Wo, p["d1_g"], p["d1_b"], act="relu")
    h = flat_to_cnhw(y, p["d1_w"].shape[1], B, Ho, Wo)

    y, Ho, Wo = conv_transpose2d_flat(h, p["d2_w"], (2, 2), (1, 1), act="none")
    y = batchnorm_act_flat(y, B * Ho * Wo, p["d2_g"], p["d2_b"], act="relu")
    h = flat_to_cnhw(y, p["d2_w"].shape[1], B, Ho, Wo)

    y, Ho, Wo = conv_transpose2d_flat(h, p["d3_w"], (2, 2), (1, 1), act="none")
    y = batchnorm_act_flat(y, B * Ho * Wo, p["d3_g"], p["d3_b"], act="relu")
    h = flat_to_cnhw(y, p["d3_w"].shape[1], B, Ho, Wo)

    y, Ho, Wo = conv_transpose2d_flat(h, p["d4_w"], (2, 2), (1, 1), act="sigmoid")
    rec_c = flat_to_cnhw(y, p["d4_w"].shape[1], B, Ho, Wo)   # (nc, B, 256, 7)

    reconstruction = jnp.transpose(rec_c, (1, 0, 2, 3))
    encoding = jnp.transpose(enc_c, (1, 0, 2, 3))
    return reconstruction, encoding


def init_params(key, nc, ndf, ngf, nz):
    ks = jax.random.split(key, 20)
    w = lambda k, s: 0.05 * jax.random.normal(k, s, jnp.float32)
    g = lambda k, n: 1.0 + 0.1 * jax.random.normal(k, (n,), jnp.float32)
    b = lambda k, n: 0.1 * jax.random.normal(k, (n,), jnp.float32)
    return {
        # Encoder (Conv2d weights are (Cout, Cin, kh, kw))
        "e1_w": w(ks[0], (ndf, nc, 4, 3)),
        "e2_w": w(ks[1], (ndf * 2, ndf, 4, 4)),
        "e2_g": g(ks[2], ndf * 2), "e2_b": b(ks[3], ndf * 2),
        "e3_w": w(ks[4], (ndf * 4, ndf * 2, 4, 4)),
        "e3_g": g(ks[5], ndf * 4), "e3_b": b(ks[6], ndf * 4),
        "e4_w": w(ks[7], (nz, ndf * 4, 32, 1)),
        # Decoder (ConvTranspose2d weights are (Cin, Cout, kh, kw))
        "d1_w": w(ks[8], (nz, ngf * 4, 32, 1)),
        "d1_g": g(ks[9], ngf * 4), "d1_b": b(ks[10], ngf * 4),
        "d2_w": w(ks[11], (ngf * 4, ngf * 2, 4, 4)),
        "d2_g": g(ks[12], ngf * 2), "d2_b": b(ks[13], ngf * 2),
        "d3_w": w(ks[14], (ngf * 2, ngf, 4, 4)),
        "d3_g": g(ks[15], ngf), "d3_b": b(ks[16], ngf),
        "d4_w": w(ks[17], (ngf, nc, 4, 3)),
    }


if __name__ == "__main__":
    nc, ndf, ngf, nz = 1, 8, 8, 16
    B, H, W = 2, 256, 12   # H=256 so the (32,1) bottleneck conv sees height 32

    key = jax.random.PRNGKey(0)
    kx, kp, kz1, kz2 = jax.random.split(key, 4)
    x = jax.random.normal(kx, (B, nc, H, W), jnp.float32)
    params = init_params(kp, nc, ndf, ngf, nz)

    # Round inputs to bf16 for the references so only accumulation order differs
    # from the bf16-MXU Pallas path.
    bf = lambda a: a.astype(jnp.bfloat16).astype(jnp.float32)

    # Check 1: Pallas im2col-matmul conv vs XLA conv (e1 geometry: (4,3), s=2, p=1).
    ref = jax.lax.conv_general_dilated(
        bf(x), bf(params["e1_w"]), (2, 2), ((1, 1), (1, 1)),
        dimension_numbers=("NCHW", "OIHW", "NCHW"),
        precision=jax.lax.Precision.HIGHEST)
    got = conv2d(x, params["e1_w"], (2, 2), (1, 1), act="none")
    np.testing.assert_allclose(np.asarray(got), np.asarray(ref),
                               rtol=2e-3, atol=2e-3)

    # Check 2: conv_transpose lowering (zero-dilation + flipped kernel + adjusted
    # padding, asymmetric (4,3) kernel, stride 2) vs the adjoint of lax.conv,
    # computed independently via jax.vjp.
    xt = jax.random.normal(kz1, (B, ngf, 128, 4), jnp.float32)
    wt = params["d4_w"]                                     # (ngf, nc, 4, 3)
    got_ct = conv_transpose2d(xt, wt, (2, 2), (1, 1), act="none")

    def conv_fwd(a):
        return jax.lax.conv_general_dilated(
            a, bf(wt), (2, 2), ((1, 1), (1, 1)),
            dimension_numbers=("NCHW", "OIHW", "NCHW"),
            precision=jax.lax.Precision.HIGHEST)

    _, vjp_fn = jax.vjp(conv_fwd, jnp.zeros((B, nc, 256, 7), jnp.float32))
    ref_ct, = vjp_fn(bf(xt))
    np.testing.assert_allclose(np.asarray(got_ct), np.asarray(ref_ct),
                               rtol=2e-3, atol=2e-3)

    # Full forward pass.
    recon, enc = jax.jit(autoencoder_forward)(x, params)
    jax.block_until_ready((recon, enc))

    assert enc.shape == (B, nz, 1, 1), enc.shape
    assert recon.shape == (B, nc, 256, 7), recon.shape
    assert bool(jnp.all(jnp.isfinite(recon))) and bool(jnp.all(jnp.isfinite(enc)))
    print("KERNEL_OK")
</pallas_src>

<mosaic_0001>
module attributes {stable_mosaic.version = 11 : i64} {
  func.func @_matmul_act_kernel(%arg0: i32, %arg1: memref<8x16xbf16, #tpu.memory_space<vmem>>, %arg2: memref<16x512xbf16, #tpu.memory_space<vmem>>, %arg3: memref<8x512xf32, #tpu.memory_space<vmem>>) attributes {dimension_semantics = [#tpu.dimension_semantics<parallel>], iteration_bounds = array<i64: 3>, scalar_prefetch = 0 : i64, scratch_operands = 0 : i64, tpu.core_type = #tpu.core_type<tc>, window_params = [{pipeline_mode = #tpu.pipeline_mode<synchronous>, transform_indices = @transform_0, window_bounds = array<i64: 8, 16>}, {transform_indices = @transform_1, window_bounds = array<i64: 16, 512>}, {transform_indices = @transform_2, window_bounds = array<i64: 8, 512>}]} {
    %c0 = arith.constant 0 : index
    %c0_0 = arith.constant 0 : index
    %0 = vector.load %arg1[%c0, %c0_0] : memref<8x16xbf16, #tpu.memory_space<vmem>>, vector<8x16xbf16>
    %c0_1 = arith.constant 0 : index
    %c0_2 = arith.constant 0 : index
    %1 = vector.load %arg2[%c0_1, %c0_2] : memref<16x512xbf16, #tpu.memory_space<vmem>>, vector<16x512xbf16>
    %cst = arith.constant dense<0.000000e+00> : vector<8x512xf32>
    %2 = tpu.matmul %0, %1, %cst {dimension_numbers = #tpu.dot_dimension_numbers<[1], [0], [0], [1], [0, 0, 1, 1], [], []>} : vector<8x16xbf16>, vector<16x512xbf16>, vector<8x512xf32> -> vector<8x512xf32>
    %c0_3 = arith.constant 0 : index
    %c0_4 = arith.constant 0 : index
    %3 = vector.load %arg3[%c0_3, %c0_4] : memref<8x512xf32, #tpu.memory_space<vmem>>, vector<8x512xf32>
    tpu.vector_store %arg3[%c0_3, %c0_4], %2 {strides = array<i32>} : memref<8x512xf32, #tpu.memory_space<vmem>>, vector<8x512xf32>,
    return
  }
  func.func @transform_0(%arg0: i32) -> (i32, i32) {
    %c0_i32 = arith.constant 0 : i32
    %c0_i32_0 = arith.constant 0 : i32
    %c0_i32_1 = arith.constant 0 : i32
    return %c0_i32, %c0_i32_0 : i32, i32
  }
  func.func @transform_1(%arg0: i32) -> (i32, i32) {
    %c0_i32 = arith.constant 0 : i32
    %c0_i32_0 = arith.constant 0 : i32
    return %c0_i32, %arg0 : i32, i32
  }
  func.func @transform_2(%arg0: i32) -> (i32, i32) {
    %c0_i32 = arith.constant 0 : i32
    %c0_i32_0 = arith.constant 0 : i32
    return %c0_i32, %arg0 : i32, i32
  }
}

</mosaic_0001>

<bundles_post_ra>
// kernel: tpu_custom_call.1
= control target key start
LH: loop header
LB: loop body
LE: loop exit
PB: predicated region body
PF: predicated region fallthrough
CT: control target
= control target key end

     0   :  { %7 = vsyncpa [#allocation3], 0  ;;  %s827_s0 = inlined_call_operand.hbm [shape: bf16[8,16], index: 0, kind: input, shape index: {}]   ;;  %s828_s1 = inlined_call_operand.hbm [shape: bf16[16,1536], index: 1, kind: input, shape index: {}]   ;;  %s829_s2 = inlined_call_operand.hbm [shape: f32[8,1536], index: 2, kind: output, shape index: {}]  }
   0x1   :  { %8 = vsyncpa [#allocation6], 0 }
   0x2   :  { %10 = vsyncpa [#allocation6 + $0x1], 0 }
   0x3   :  { %11 = vsyncpa [#allocation4], 0 }
   0x4   :  { %13 = vsyncpa [#allocation4 + $0x1], 0  ;;  %s633_s9 = smov 0   ;;  %s635_s10 = smov 0  }
   0x5   :  { %s637_s11 = smov 0   ;;  %s639_s12 = smov 0  }
   0x6 LB: > { %s654_s13 = sadd.s32 4294967295, %s609_s12   ;;  %s390_s14 = sadd.s32 4294967294, %s609_s12   ;;  %s609_s12 = sphi %s639_s12, %s852_s12   ;;  %s605_s11 = sphi %s637_s11, %s851_s11   ;;  %s601_s10 = sphi %s635_s10, %s850_s10   ;;  %s597_s9 = sphi %s633_s9, %s849_s9  }
   0x7   : > { %s658_s15 = sadd.s32 1, %s609_s12   ;;  %s47_s16 = sadd.s32 1, %s605_s11 }
   0x8   : > { %s44_s17 = ssub.s32 %s609_s12, %s658_s15  ;;  %p54_p0 = scmp.ne.s32.totalorder %s605_s11, %s601_s10 }
   0x9   : > { %p45_p1 = scmp.eq.s32.totalorder %s44_s17, 0  ;;  %p55_p2 = scmp.eq.s32.totalorder %s609_s12, 0 }
   0xa   : > { %p60_p3 = scmp.ne.s32.totalorder %s601_s10, %s597_s9  ;;  %p830_p4 = scmp.eq.s32.totalorder %s654_s13, 0 }
   0xb   : > { %s670_s18 = scalar_select %p45_p1, %s605_s11, %s47_s16  }
   0xc   : > { %p672_p5 = por %p55_p2, %p54_p0  ;;  %p678_p6 = por %p830_p4, %p60_p3 }
   0xd   : > { %p84_p7 = scmp.eq.s32.totalorder %s654_s13, 2  ;;  %p90_p8 = scmp.eq.s32.totalorder %s390_s14, 2 }
   0xe   : > { %s836_s20 = scalar_select %p678_p6, 1, 0 }
   0xf   : > { %p391_p9 = scmp.ge.s32.totalorder %s609_s12, 1  ;;  %p97_p10 = scmp.lt.s32.totalorder %s609_s12, 4 }
  0x10   : > { %p685_p11 = por %p84_p7, %p54_p0  ;;  %p689_p12 = por %p90_p8, %p60_p3 }
  0x11   : > { %p693_p13 = pnand %p391_p9, %p97_p10  ;;  %s611_s24 = smov [#allocation2]  }
  0x12   : > { %s837_s21 = scalar_select %p685_p11, 1, 0 }
  0x13   : > { %s838_s22 = scalar_select %p689_p12, 1, 0 }
  0x14   : > { %s839_s23 = scalar_select %p693_p13, 1, 0 }
  0x15   : > { %p422_p1 = pneg %p693_p13  ;;  %s110_s25 = sshll.u32 %s611_s24, 4  ;;  %s111_s25 = int_to_ptr.vmem [resolvable:$true] %s110_s25 }
  0x16   : > { %p435_p2 = scmp.lt.s32.totalorder %s609_s12, 3  ;;  %s121_s27 = sand.u32 1, %s605_s11  }
  0x17   : > { %p702_p0 = pnand %p422_p1, %p830_p4  ;;  %s394_s29 = sshll.u32 %s121_s27, 5 }
  0x18   : > { %p709_p3 = pnand %p435_p2, %p672_p5  ;;  %s481_s4 = scalar_lea.hbm %s827_s0, 64 }
  0x19   : > { %p482_p7 = scmp.ne.s32.totalorder %s827_s0, %s481_s4  ;;  %p483_p8 = pneg %p702_p0 }
  0x1a   : > { %s841_s28 = scalar_select %p709_p3, 1, 0 }
  0x1b   : > { %p484_p9 = pnand %p483_p8, %p482_p7  ;;  %p488_p5 = scmp.lt.u32.totalorder %s481_s4, %s827_s0 }
  0x1d   : > { %p485_p10 = pneg %p484_p9 }
  0x1f   : > { %p490_p1 = pnand %p488_p5, %p485_p10 }
  0x21   : > { %493 = shalt.err (!%p490_p1)
}
  0x22   : > { %s494_s14 = scalar_lea.vmem %s111_s25, 64  ;;  %p502_p11 = scmp.lt.s32.totalorder %s111_s25, %s111_s25 }
  0x23   : > { %p495_p2 = scmp.ne.s32.totalorder %s111_s25, %s494_s14  ;;  %p503_p6 = scmp.lt.s32.totalorder %s494_s14, %s494_s14 }
  0x25   : > { %p497_p4 = pnand %p495_p2, %p483_p8  ;;  %p504_p13 = por %p503_p6, %p502_p11 }
  0x27   : > { %p498_p12 = pneg %p497_p4 }
  0x29   : > { %p505_p3 = pnand %p504_p13, %p498_p12 }
  0x2b   : > { %508 = shalt.err (!%p505_p3)
}
  0x2c   : > { %425 = dma.hbm_to_vmem [thread:$0]  (!%p702_p0), %s827_s0, 64, %s111_s25, [#allocation3]  }
  0x2d   : > { %s412_s19 = sshll.u32 %s609_s12, 8  ;;  %s125_s24 = scalar_lea.vmem [#allocation5], %s394_s29 }
  0x2e   : > { %s132_s30 = sshll.u32 %s125_s24, 4  ;;  %s733_s5 = scalar_lea.hbm %s828_s1, %s412_s19  ;;  %s735_s30 = int_to_ptr.vmem [resolvable:$true] %s132_s30 }
  0x2f   : > { %s737_s26 = scalar_lea.sflag [#allocation6], %s121_s27  ;;  %s509_s6 = scalar_lea.hbm %s733_s5, 512 }
  0x30   : > { %p510_p4 = scmp.ne.s32.totalorder %s733_s5, %s509_s6  ;;  %p842_p6 = scmp.ne.s32.totalorder %s841_s28, 0 }
  0x31   : > { %s514_s7 = scalar_lea.hbm %s828_s1, 1536  ;;  %p515_p0 = scmp.lt.u32.totalorder %s733_s5, %s828_s1 }
  0x32   : > { %p511_p11 = pneg %p842_p6  ;;  %p516_p3 = scmp.lt.u32.totalorder %s514_s7, %s509_s6 }
  0x33   : > { %p518_p8 = scmp.lt.u32.totalorder %s509_s6, %s733_s5 }
  0x34   : > { %p512_p12 = pnand %p511_p11, %p510_p4  ;;  %p517_p7 = por %p516_p3, %p515_p0 }
  0x36   : > { %p513_p13 = pneg %p512_p12  ;;  %p519_p9 = por %p518_p8, %p517_p7 }
  0x38   : > { %p520_p10 = pnand %p519_p9, %p513_p13 }
  0x3a   : > { %523 = shalt.err (!%p520_p10)
}
  0x3b   : > { %s524_s27 = scalar_lea.vmem %s735_s30, 512  ;;  %s612_s16 = smov [#allocation5]  }
  0x3c   : > { %p525_p5 = scmp.ne.s32.totalorder %s735_s30, %s524_s27  ;;  %s529_s17 = sshll.u32 %s612_s16, 4  ;;  %s530_s17 = int_to_ptr.vmem [resolvable:$false] %s529_s17 }
  0x3d   : > { %s531_s19 = scalar_lea.vmem %s530_s17, 1024  ;;  %p532_p4 = scmp.lt.s32.totalorder %s735_s30, %s530_s17 }
  0x3e   : > { %p527_p1 = pnand %p525_p5, %p511_p11  ;;  %p533_p12 = scmp.lt.s32.totalorder %s531_s19, %s524_s27 }
  0x40   : > { %p528_p2 = pneg %p527_p1  ;;  %p534_p0 = por %p533_p12, %p532_p4 }
  0x42   : > { %p535_p3 = pnand %p534_p0, %p528_p2 }
  0x44   : > { %538 = shalt.err (!%p535_p3)
}
  0x45   : > { %s613_s24 = smov 768   ;;  %s614_s3 = smov 256  }
  0x46   : > { %s615_s4 = smov 16   ;;  %p843_p11 = scmp.ne.s32.totalorder %s839_s23, 0 }
  0x47   : > { %429 = dma.hbm_to_vmem [thread:$0]  (!%p842_p6), %s733_s5, 512, %s735_s30, %s737_s26, %s613_s24, %s614_s3, %s615_s4  }
  0x48   : > { %144 = sbr.rel (%p843_p11) target bundleno = 318 (0x13e), region = 28  ;;  %p844_p13 = scmp.eq.s32.totalorder (!%p843_p11), %s654_s13, 0 }
  0x4f   : > { %584 = dma.done.wait (%p844_p13), [#allocation3], 64   ;;  %p845_p7 = pmov %p844_p13 }
  0x50   : > { %s772_s6 = sand.u32 1, %s601_s10   ;;  %p846_p8 = scmp.ne.s32.totalorder %s836_s20, 0 }
  0x51   : > { %586 = vsyncadd (%p845_p7), [#allocation3], 4294967232  ;;  %s399_s25 = sshll.u32 %s772_s6, 5  ;;  %s151_s29 = scalar_lea.sflag [#allocation6], %s772_s6 }
  0x52   : > { %s154_s7 = scalar_lea.vmem [#allocation5], %s399_s25 }
  0x53   : > { %588 = dma.done.wait (%p846_p8), %s151_s29, 512  }
  0x54   : > { %590 = vsyncadd (%p846_p8), %s151_s29, 4294966784  ;;  %v616_v0 = vmov 0   ;;  %v475_v1 = vld [vmem:[%s154_s7 + $0x4] ss:$16 sps:$4 sm:$0xff]   ;;  %v477_v2 = vld [vmem:[%s154_s7 + $0xc] ss:$16 sps:$4 sm:$0xff]  }
  0x55   : > { %239 = vmatprep.mubr.bf16.mxu0 %v616_v0  ;;  %280 = vmatprep.mubr.bf16.mxu1 %v616_v0  ;;  %v479_v3 = vld [vmem:[%s154_s7] ss:$16 sps:$4 sm:$0xff]   ;;  %v480_v4 = vld [vmem:[%s154_s7 + $0x8] ss:$16 sps:$4 sm:$0xff]   ;;  %v178_v5 = vld [vmem:[#allocation2] sm:$0xf] }
  0x56   : > { %207 = vmatprep.subr.bf16.mxu0 %v475_v1  ;;  %248 = vmatprep.subr.bf16.mxu1 %v477_v2  ;;  %vm203_vm0 = vcmask 130048   ;;  %s174_s23 = scalar_lea.vmem [#allocation7], %s399_s25  ;;  %s413_s20 = sshll.u32 %s654_s13, 9 }
  0x57   : > { %208 = vmatpush1.bf16.msra.mxu0 %v479_v3  ;;  %249 = vmatpush1.bf16.msra.mxu1 %v480_v4  ;;  %s308_s28 = sshll.u32 %s174_s23, 4  ;;  %s786_s26 = scalar_lea.hbm %s829_s2, %s413_s20  ;;  %s781_s28 = int_to_ptr.vmem [resolvable:$true] %s308_s28 }
  0x58   : > { %s294_s13 = scalar_lea.sflag [#allocation4], %s772_s6  ;;  %s539_s8 = scalar_lea.vmem %s781_s28, 512 }
  0x59   : > { %p540_p6 = scmp.ne.s32.totalorder %s781_s28, %s539_s8  ;;  %p847_p9 = scmp.ne.s32.totalorder %s837_s21, 0 }
  0x5a   : > { %405 = vmatmul.mubr.msk.bf16.vlgmr.msra.gmra.mrb[0].mxu0 %vm203_vm0, %v178_v5  ;;  %406 = vmatmul.mubr.msk.bf16.vlgmr.msra.gmra.mrb[0].mxu1 %vm203_vm0, %v178_v5  ;;  %s617_s14 = smov [#allocation7]  }
  0x5b   : > { %p541_p10 = pnand %p540_p6, %p847_p9  ;;  %s543_s27 = sshll.u32 %s617_s14, 4  ;;  %s544_s27 = int_to_ptr.vmem [resolvable:$false] %s543_s27 }
  0x5c   : > { %s545_s16 = scalar_lea.vmem %s544_s27, 1024  ;;  %p546_p1 = scmp.lt.s32.totalorder %s781_s28, %s544_s27 }
  0x5d   : > { %p542_p5 = pneg %p541_p10  ;;  %p547_p2 = scmp.lt.s32.totalorder %s545_s16, %s539_s8 }
  0x5f   : > { %p548_p4 = por %p547_p2, %p546_p1 }
  0x61   : > { %p549_p12 = pnand %p548_p4, %p542_p5 }
 0x12d   : > { %v241_v6 = vpop.f32.mrb[0].mxu0  ;;  %v282_v7 = vpop.f32.mrb[0].mxu1 }
 0x12e   : > { %289 = vst [vmem:[%s174_s23] sm:$0xff] %v241_v6  ;;  %291 = vst [vmem:[%s174_s23 + $0x10] sm:$0xff] %v282_v7  ;;  %v243_v8 = vpop.f32.mrb[1].mxu0  ;;  %v284_v9 = vpop.f32.mrb[1].mxu1 }
 0x12f   : > { %290 = vst [vmem:[%s174_s23 + $0x8] sm:$0xff] %v243_v8  ;;  %292 = vst [vmem:[%s174_s23 + $0x18] sm:$0xff] %v284_v9  ;;  %v245_v10 = vpop.f32.mrb[2].mxu0  ;;  %v286_v11 = vpop.f32.mrb[2].mxu1 }
 0x130   : > { %v246_v12 = vpop.f32.mrb[3].mxu0  ;;  %v287_v13 = vpop.f32.mrb[3].mxu1 }
 0x131   : > { %552 = shalt.err (!%p549_p12)
}
 0x132   : > { %s553_s17 = scalar_lea.hbm %s786_s26, 512  ;;  %s557_s3 = scalar_lea.hbm %s829_s2, 1536 }
 0x133   : > { %p554_p0 = scmp.ne.s32.totalorder %s786_s26, %s553_s17  ;;  %p558_p13 = scmp.lt.u32.totalorder %s786_s26, %s829_s2 }
 0x134   : > { %p559_p7 = scmp.lt.u32.totalorder %s557_s3, %s553_s17  ;;  %p561_p6 = scmp.lt.u32.totalorder %s553_s17, %s786_s26 }
 0x135   : > { %p555_p3 = pnand %p554_p0, %p847_p9 }
 0x136   : > { %p560_p8 = por %p559_p7, %p558_p13 }
 0x137   : > { %p556_p11 = pneg %p555_p3 }
 0x138   : > { %p562_p10 = por %p561_p6, %p560_p8 }
 0x13a   : > { %p563_p5 = pnand %p562_p10, %p556_p11 }
 0x13c   : > { %566 = shalt.err (!%p563_p5)
}
 0x13d   : > { %420 = dma.vmem_to_hbm [thread:$0]  (%p847_p9), %s781_s28, 512, %s786_s26, %s294_s13  }
 0x13e PF: > { %p437_p1 = scmp.ge.s32.totalorder %s609_s12, 2  ;;  %s320_s25 = sand.u32 1, %s597_s9  }
 0x13f   : > { %p848_p2 = scmp.ne.s32.totalorder %s838_s22, 0  ;;  %s321_s29 = scalar_lea.sflag [#allocation4], %s320_s25 }
 0x141   : > { %p431_p4 = pnand %p437_p1, %p848_p2 }
 0x143   : > { %592 = dma.done.wait (!%p431_p4), %s321_s29, 512  }
 0x144   : > { %594 = vsyncadd (!%p431_p4), %s321_s29, 4294966784  ;;  %p16_p12 = scmp.ge.s32.totalorder %s658_s15, 5   ;;  %s849_s9 = smov %s601_s10 }
 0x145   : > { %s850_s10 = smov %s605_s11  ;;  %s851_s11 = smov %s670_s18 }
 0x146   : > { %s852_s12 = smov %s658_s15  ;;  %18 = sbr.rel (!%p16_p12) target bundleno = 6 (0x6), region = 78 }
 0x14d   :  { %326 = vsyncpa [#allocation3], 1 }
 0x14e   :  { %328 = vsyncpa [#allocation3 + $0x1], 1 }
 0x14f   :  { %329 = vsyncpa [#allocation6], 1 }
 0x150   :  { %331 = vsyncpa [#allocation6 + $0x1], 1 }
 0x151   :  { %332 = vsyncpa [#allocation4], 1 }
 0x152   :  { %334 = vsyncpa [#allocation4 + $0x1], 1 }

</bundles_post_ra>
